<compile_context>
chip_gen: v6e
topology: v6e:2x2x1
jax: 0.10.0
libtpu: 0.0.40
codegen_flags: <defaults>
</compile_context>

<pallas_src>
import functools

import jax
import jax.numpy as jnp
from jax import lax
from jax.experimental import pallas as pl
from jax.experimental.pallas import tpu as pltpu


def _round_up(x, m):
    return ((x + m - 1) // m) * m


_MAX_FULL_K = 1024  # keep full-K tiles modest: safe for v5e scoped VMEM & v7x 64 MiB


# ---------------------------------------------------------------------------
# Kernels
# ---------------------------------------------------------------------------
def _linear_kernel_single_k(x_ref, w_ref, b_ref, o_ref):
    # Whole (padded) reduction dim in one K tile: no accumulator scratch.
    # x_ref: (tm, K_pad)  w_ref: (tn, K_pad)  b_ref: (1, tn)  o_ref: (tm, tn)
    acc = lax.dot_general(
        x_ref[...], w_ref[...],
        dimension_numbers=(((1,), (1,)), ((), ())),   # x @ W^T, no transpose op
        preferred_element_type=jnp.float32,
    )
    o_ref[...] = (acc + b_ref[...]).astype(o_ref.dtype)


def _linear_kernel_multi_k(x_ref, w_ref, b_ref, o_ref, acc_ref):
    # K streamed as an "arbitrary" grid reduction axis with f32 VMEM accumulator.
    k = pl.program_id(2)

    @pl.when(k == 0)
    def _():
        acc_ref[...] = jnp.zeros_like(acc_ref)

    acc_ref[...] += lax.dot_general(
        x_ref[...], w_ref[...],
        dimension_numbers=(((1,), (1,)), ((), ())),
        preferred_element_type=jnp.float32,
    )

    @pl.when(k == pl.num_programs(2) - 1)
    def _():
        o_ref[...] = (acc_ref[...] + b_ref[...]).astype(o_ref.dtype)


# ---------------------------------------------------------------------------
# Wrapper
# ---------------------------------------------------------------------------
def _encoder_forward_impl(x, weight, bias, *, compute_dtype=None,
                          max_full_k=_MAX_FULL_K):
    """Linear forward: (B, K) x (N, K)^T + (N,) -> (B, N)."""
    B, K = x.shape
    N, K2 = weight.shape
    assert K == K2 and bias.shape == (N,)

    out_dtype = x.dtype
    cdt = jnp.dtype(compute_dtype) if compute_dtype is not None else jnp.dtype(out_dtype)

    # ----- tiling plan (all static under jit) -------------------------------
    # Lane-dense output: 128-pad small latent dims, 256-pad wider ones so
    # tn=256 matches the 256-lane MXU on v6e/v7x.
    if N <= 128:
        N_pad, tn = 128, 128
    else:
        N_pad, tn = _round_up(N, 256), 256

    # Always lane-align K: unmasked loads, full-width MXU passes.
    K_pad = _round_up(K, 128)
    if K_pad <= max_full_k:
        tk = K_pad                       # whole reduction in a single K step
    else:
        tk = min(512, max_full_k)        # streamed K
        K_pad = _round_up(K, tk)
    grid_k = K_pad // tk

    # Tall batch tiles cut weight re-reads (weight HBM traffic ~ ceil(B/tm)*K*N).
    tm_cap = 1024 if B >= 1024 else 512
    tm = min(tm_cap, _round_up(B, 8))

    # v7x has 2 TensorCores engaged only via parallel grid axes: ensure >= 2
    # parallel tiles when there is enough work (no effect on v5e/v6e).
    if pl.cdiv(B, tm) * (N_pad // tn) == 1 and B >= 16:
        tm = _round_up(pl.cdiv(B, 2), 8)

    grid_m = pl.cdiv(B, tm)
    grid_n = N_pad // tn

    # ----- padding / casting (no-ops when already aligned) ------------------
    xp = x if K_pad == K else jnp.pad(x, ((0, 0), (0, K_pad - K)))
    wp = weight
    if N_pad != N or K_pad != K:
        wp = jnp.pad(weight, ((0, N_pad - N), (0, K_pad - K)))
    if cdt != jnp.dtype(out_dtype):
        xp = xp.astype(cdt)
        wp = wp.astype(cdt)
    bp = bias if N_pad == N else jnp.pad(bias, (0, N_pad - N))
    bp = bp.reshape(1, N_pad).astype(jnp.float32)

    # ----- VMEM budget & cost hint ------------------------------------------
    in_b = cdt.itemsize
    out_b = jnp.dtype(out_dtype).itemsize
    footprint = (2 * (tm * tk + tn * tk) * in_b       # double-buffered x / W tiles
                 + 2 * (tm * tn) * out_b              # double-buffered out tiles
                 + 2 * tn * 4)                        # bias tiles
    if grid_k > 1:
        footprint += tm * tn * 4                      # f32 accumulator scratch
    vmem_limit = int(min(64 * 1024 * 1024,
                         max(16 * 1024 * 1024,
                             footprint + footprint // 2 + (2 << 20))))

    cost = pl.CostEstimate(
        flops=2 * B * K_pad * N_pad,
        transcendentals=0,
        bytes_accessed=(B * K_pad * in_b                     # x read once
                        + grid_m * N_pad * K_pad * in_b      # W re-read per M tile
                        + B * N_pad * out_b + N_pad * 4),    # out + bias
    )

    if grid_k == 1:
        grid = (grid_m, grid_n)
        in_specs = [
            pl.BlockSpec((tm, tk), lambda i, j: (i, 0)),     # x tile
            pl.BlockSpec((tn, tk), lambda i, j: (j, 0)),     # weight tile (N, K)
            pl.BlockSpec((1, tn), lambda i, j: (0, j)),      # bias tile
        ]
        out_specs = pl.BlockSpec((tm, tn), lambda i, j: (i, j))
        kernel = _linear_kernel_single_k
        scratch = []
        dim_sem = ("parallel", "parallel")
    else:
        grid = (grid_m, grid_n, grid_k)
        in_specs = [
            pl.BlockSpec((tm, tk), lambda i, j, k: (i, k)),
            pl.BlockSpec((tn, tk), lambda i, j, k: (j, k)),
            pl.BlockSpec((1, tn), lambda i, j, k: (0, j)),
        ]
        out_specs = pl.BlockSpec((tm, tn), lambda i, j, k: (i, j))
        kernel = _linear_kernel_multi_k
        scratch = [pltpu.VMEM((tm, tn), jnp.float32)]
        dim_sem = ("parallel", "parallel", "arbitrary")

    out = pl.pallas_call(
        kernel,
        out_shape=jax.ShapeDtypeStruct((B, N_pad), out_dtype),
        grid_spec=pltpu.PrefetchScalarGridSpec(
            num_scalar_prefetch=0,
            grid=grid,
            in_specs=in_specs,
            out_specs=out_specs,
            scratch_shapes=scratch,
        ),
        compiler_params=pltpu.CompilerParams(
            dimension_semantics=dim_sem,
            vmem_limit_bytes=vmem_limit,
        ),
        cost_estimate=cost,
    )(xp, wp, bp)

    return out[:, :N] if N_pad != N else out


@functools.partial(jax.jit, static_argnames=("compute_dtype", "max_full_k"))
def encoder_forward(x, weight, bias, *, compute_dtype=None, max_full_k=_MAX_FULL_K):
    return _encoder_forward_impl(x, weight, bias,
                                 compute_dtype=compute_dtype,
                                 max_full_k=max_full_k)


if __name__ == "__main__":
    key = jax.random.PRNGKey(0)
    k_x, k_w, k_b = jax.random.split(key, 3)

    batch_size = 8
    input_dim = 32      # e.g. number of HVGs (small synthetic)
    latent_dim = 16

    x = jax.random.normal(k_x, (batch_size, input_dim), dtype=jnp.float32)
    # Deterministic parameter init (synthetic, not a checkpoint load).
    bound = 1.0 / (input_dim ** 0.5)
    weight = jax.random.uniform(
        k_w, (latent_dim, input_dim), minval=-bound, maxval=bound,
        dtype=jnp.float32)
    bias = jax.random.uniform(
        k_b, (latent_dim,), minval=-bound, maxval=bound, dtype=jnp.float32)

    ref = x @ weight.T + bias

    # 1) Default f32 path (single-K-step kernel, no accumulator scratch).
    out = encoder_forward(x, weight, bias)
    jax.block_until_ready(out)
    assert out.shape == (batch_size, latent_dim)
    assert jnp.allclose(out, ref, atol=1e-5, rtol=1e-5)

    # 2) bf16 compute path (halves HBM bytes; f32 accumulation, f32 output).
    out_bf16 = encoder_forward(x, weight, bias, compute_dtype=jnp.bfloat16)
    jax.block_until_ready(out_bf16)
    assert jnp.allclose(out_bf16, ref, atol=5e-2, rtol=5e-2)

    # 3) Streamed-K (multi-step accumulator) path with a ragged batch, to
    #    exercise pl.when init/finalize and partial-M-block output masking.
    b2, k2, n2 = 10, 300, 16
    kx2, kw2, kb2 = jax.random.split(jax.random.PRNGKey(1), 3)
    x2 = jax.random.normal(kx2, (b2, k2), dtype=jnp.float32)
    w2 = jax.random.normal(kw2, (n2, k2), dtype=jnp.float32) * (1.0 / k2 ** 0.5)
    bb2 = jax.random.normal(kb2, (n2,), dtype=jnp.float32)
    out2 = encoder_forward(x2, w2, bb2, max_full_k=128)
    jax.block_until_ready(out2)
    ref2 = x2 @ w2.T + bb2
    assert out2.shape == (b2, n2)
    assert jnp.allclose(out2, ref2, atol=1e-3, rtol=1e-3)

    print("KERNEL_OK")
</pallas_src>

<mosaic_0001>
module attributes {stable_mosaic.version = 11 : i64} {
  func.func @_linear_kernel_single_k(%arg0: i32, %arg1: i32, %arg2: memref<8x128xf32, #tpu.memory_space<vmem>>, %arg3: memref<128x128xf32, #tpu.memory_space<vmem>>, %arg4: memref<1x128xf32, #tpu.memory_space<vmem>>, %arg5: memref<8x128xf32, #tpu.memory_space<vmem>>) attributes {dimension_semantics = [#tpu.dimension_semantics<parallel>, #tpu.dimension_semantics<parallel>], iteration_bounds = array<i64: 1, 1>, scalar_prefetch = 0 : i64, scratch_operands = 0 : i64, tpu.core_type = #tpu.core_type<tc>, window_params = [{transform_indices = @transform_0, window_bounds = array<i64: 8, 128>}, {transform_indices = @transform_1, window_bounds = array<i64: 128, 128>}, {transform_indices = @transform_2, window_bounds = array<i64: 1, 128>}, {transform_indices = @transform_3, window_bounds = array<i64: 8, 128>}]} {
    %c0 = arith.constant 0 : index
    %c0_0 = arith.constant 0 : index
    %0 = vector.load %arg2[%c0, %c0_0] : memref<8x128xf32, #tpu.memory_space<vmem>>, vector<8x128xf32>
    %c0_1 = arith.constant 0 : index
    %c0_2 = arith.constant 0 : index
    %1 = vector.load %arg3[%c0_1, %c0_2] : memref<128x128xf32, #tpu.memory_space<vmem>>, vector<128x128xf32>
    %cst = arith.constant dense<0.000000e+00> : vector<8x128xf32>
    %2 = tpu.matmul %0, %1, %cst {dimension_numbers = #tpu.dot_dimension_numbers<[1], [1], [0], [0], [0, 0, 1, 0], [], []>} : vector<8x128xf32>, vector<128x128xf32>, vector<8x128xf32> -> vector<8x128xf32>
    %c0_3 = arith.constant 0 : index
    %c0_4 = arith.constant 0 : index
    %3 = vector.load %arg4[%c0_3, %c0_4] : memref<1x128xf32, #tpu.memory_space<vmem>>, vector<1x128xf32>
    %4 = vector.broadcast %3 : vector<1x128xf32> to vector<8x128xf32>
    %5 = arith.addf %2, %4 : vector<8x128xf32>
    %c0_5 = arith.constant 0 : index
    %c0_6 = arith.constant 0 : index
    %6 = vector.load %arg5[%c0_5, %c0_6] : memref<8x128xf32, #tpu.memory_space<vmem>>, vector<8x128xf32>
    tpu.vector_store %arg5[%c0_5, %c0_6], %5 {strides = array<i32>} : memref<8x128xf32, #tpu.memory_space<vmem>>, vector<8x128xf32>,
    return
  }
  func.func @transform_0(%arg0: i32, %arg1: i32) -> (i32, i32) {
    %c0_i32 = arith.constant 0 : i32
    %c0_i32_0 = arith.constant 0 : i32
    return %arg0, %c0_i32 : i32, i32
  }
  func.func @transform_1(%arg0: i32, %arg1: i32) -> (i32, i32) {
    %c0_i32 = arith.constant 0 : i32
    %c0_i32_0 = arith.constant 0 : i32
    return %arg1, %c0_i32 : i32, i32
  }
  func.func @transform_2(%arg0: i32, %arg1: i32) -> (i32, i32) {
    %c0_i32 = arith.constant 0 : i32
    %c0_i32_0 = arith.constant 0 : i32
    return %c0_i32, %arg1 : i32, i32
  }
  func.func @transform_3(%arg0: i32, %arg1: i32) -> (i32, i32) {
    %c0_i32 = arith.constant 0 : i32
    return %arg0, %arg1 : i32, i32
  }
}

</mosaic_0001>

<bundles_post_ra>
// kernel: encoder_forward.1
= control target key start
LH: loop header
LB: loop body
LE: loop exit
PB: predicated region body
PF: predicated region fallthrough
CT: control target
= control target key end

     0   :  { %v202_v1 = vmov 0.0   ;;  %vm203_vm0 = vmmov 0   ;;  %s282_s0 = inlined_call_operand.vmem [shape: f32[8,128], index: 0, kind: input, shape index: {}]   ;;  %s283_s1 = inlined_call_operand.vmem [shape: f32[128,128], index: 1, kind: input, shape index: {}]   ;;  %s284_s2 = inlined_call_operand.vmem [shape: f32[1,128], index: 2, kind: input, shape index: {}]   ;;  %s285_s3 = inlined_call_operand.hbm [shape: f32[8,128], index: 3, kind: output, shape index: {}]  }
   0x1   :  { %v31_v0 = vld [vmem:[%s283_s1 + $0x78] sm:$0xff]  ;;  %142 = vmatprep.subr.mxu0 %v202_v1  ;;  %174 = vmatprep.mubr.msk.f32.mxu0 %vm203_vm0, %v202_v1  ;;  %v30_v2 = vld [vmem:[%s283_s1 + $0x70] sm:$0xff] }
   0x2   :  { %143 = vmatpush3.xpose.msra.mxu0 %v31_v0 }
   0x3   :  { %144 = vmatprep.subr.mxu0 %v202_v1 }
   0x6   :  { %145 = vmatpush3.xpose.msra.mxu0 %v30_v2 }
   0x7   :  { %8 = vsyncpa [#allocation3], 0  ;;  %146 = vmatprep.subr.mxu0 %v202_v1  ;;  %v29_v3 = vld [vmem:[%s283_s1 + $0x68] sm:$0xff]  ;;  %v28_v4 = vld [vmem:[%s283_s1 + $0x60] sm:$0xff]  ;;  %s204_s21 = smov [#allocation2]  }
   0x8   :  { %v27_v5 = vld [vmem:[%s283_s1 + $0x58] sm:$0xff]  ;;  %v26_v6 = vld [vmem:[%s283_s1 + $0x50] sm:$0xff]  ;;  %v25_v7 = vld [vmem:[%s283_s1 + $0x48] sm:$0xff]  ;;  %s116_s22 = sshll.u32 %s204_s21, 4  ;;  %s117_s22 = int_to_ptr.vmem [resolvable:$true] %s116_s22 }
   0x9   :  { %v24_v8 = vld [vmem:[%s283_s1 + $0x40] sm:$0xff]  ;;  %v23_v9 = vld [vmem:[%s283_s1 + $0x38] sm:$0xff]  ;;  %v22_v10 = vld [vmem:[%s283_s1 + $0x30] sm:$0xff]  ;;  %s180_s23 = scalar_lea.vmem %s117_s22, 128  ;;  %p185_p1 = scmp.lt.s32.totalorder %s117_s22, %s117_s22 }
   0xa   :  { %147 = vmatpush3.xpose.msra.mxu0 %v29_v3  ;;  %v21_v11 = vld [vmem:[%s283_s1 + $0x28] sm:$0xff]  ;;  %v20_v12 = vld [vmem:[%s283_s1 + $0x20] sm:$0xff]  ;;  %v19_v13 = vld [vmem:[%s283_s1 + $0x18] sm:$0xff]  ;;  %p181_p0 = scmp.ne.s32.totalorder %s117_s22, %s180_s23  ;;  %p186_p2 = scmp.lt.s32.totalorder %s180_s23, %s180_s23 }
   0xb   :  { %148 = vmatprep.subr.mxu0 %v202_v1  ;;  %v18_v14 = vld [vmem:[%s283_s1 + $0x10] sm:$0xff]  ;;  %v17_v15 = vld [vmem:[%s283_s1 + $0x8] sm:$0xff]  ;;  %v16_v16 = vld [vmem:[%s283_s1] sm:$0xff] }
   0xc   :  { %v15_v17 = vld [vmem:[%s282_s0] sm:$0xff]  ;;  %p187_p3 = por %p186_p2, %p185_p1 }
   0xd   :  { %v124_v18 = vld [vmem:[%s284_s2] ss:$0 sm:$0xff] }
   0xe   :  { %149 = vmatpush3.xpose.msra.mxu0 %v28_v4  ;;  %p188_p4 = pnand %p187_p3, %p181_p0 }
   0xf   :  { %150 = vmatprep.subr.mxu0 %v202_v1 }
  0x12   :  { %151 = vmatpush3.xpose.msra.mxu0 %v27_v5 }
  0x13   :  { %152 = vmatprep.subr.mxu0 %v202_v1 }
  0x16   :  { %153 = vmatpush3.xpose.msra.mxu0 %v26_v6 }
  0x17   :  { %154 = vmatprep.subr.mxu0 %v202_v1 }
  0x1a   :  { %155 = vmatpush3.xpose.msra.mxu0 %v25_v7 }
  0x1b   :  { %156 = vmatprep.subr.mxu0 %v202_v1 }
  0x1e   :  { %157 = vmatpush3.xpose.msra.mxu0 %v24_v8 }
  0x1f   :  { %158 = vmatprep.subr.mxu0 %v202_v1 }
  0x22   :  { %159 = vmatpush3.xpose.msra.mxu0 %v23_v9 }
  0x23   :  { %160 = vmatprep.subr.mxu0 %v202_v1 }
  0x26   :  { %161 = vmatpush3.xpose.msra.mxu0 %v22_v10 }
  0x27   :  { %162 = vmatprep.subr.mxu0 %v202_v1 }
  0x2a   :  { %163 = vmatpush3.xpose.msra.mxu0 %v21_v11 }
  0x2b   :  { %164 = vmatprep.subr.mxu0 %v202_v1 }
  0x2e   :  { %165 = vmatpush3.xpose.msra.mxu0 %v20_v12 }
  0x2f   :  { %166 = vmatprep.subr.mxu0 %v202_v1 }
  0x32   :  { %167 = vmatpush3.xpose.msra.mxu0 %v19_v13 }
  0x33   :  { %168 = vmatprep.subr.mxu0 %v202_v1 }
  0x36   :  { %169 = vmatpush3.xpose.msra.mxu0 %v18_v14 }
  0x37   :  { %170 = vmatprep.subr.mxu0 %v202_v1 }
  0x3a   :  { %171 = vmatpush3.xpose.msra.mxu0 %v17_v15 }
  0x3b   :  { %172 = vmatprep.subr.mxu0 %v202_v1 }
  0x3e   :  { %173 = vmatpush3.xpose.msra.mxu0 %v16_v16 }
  0x41   :  { %175 = vmatmul.mubr.f32.vlgmr.msra.gmra.mxu0 %v15_v17 }
 0x101   :  { %v105_v19 = vpop.f32.mrf.mxu0 }
 0x102   :  { %v106_v20 = vadd.f32 %v124_v18, %v105_v19 }
 0x103   :  { %v176_v21 = vpop.f32.mrf.mxu0 }
 0x104   :  { %109 = vst [vmem:[#allocation2] sm:$0xff] %v106_v20 }
 0x105   :  { %191 = shalt.err (!%p188_p4)
}
 0x106   :  { %119 = dma.vmem_to_hbm [thread:$0]  %s117_s22, 128, %s285_s3, [#allocation3]  }
 0x107   :  { %200 = dma.done.wait [#allocation3], 128  }
 0x108   :  { %201 = vsyncadd [#allocation3], 4294967168 }
 0x109   :  { %123 = vsyncpa [#allocation3], 1 }

</bundles_post_ra>
